<compile_context>
chip_gen: v5e
topology: v5e:2x2
jax: 0.10.0
libtpu: 0.0.40
codegen_flags: <defaults>
</compile_context>

<pallas_src>
import numpy as np
import jax
import jax.numpy as jnp
from jax.experimental import pallas as pl
from jax.experimental.pallas import tpu as pltpu


def _make_amd_kernel(n_rows, tile_rows, n_cols, total_tiles,
                     needs_row_mask, has_dup_tiles):
    """Builds the fused kernel with the static problem description baked in."""

    def kernel(p_r_ref, p_f_ref, c_ref, out_fr_ref, out_rf_ref,
               acc_fr_ref, acc_rf_ref):
        # p_r_ref / p_f_ref : [TN, C]  native dtype (f32 or bf16)
        # c_ref             : [TN, 2]  f32, col 0 = c_f, col 1 = c_r
        # out_*_ref         : [1, 1, 128] f32 per-chunk partial sums
        # acc_*_ref         : [TN, C]  f32 VMEM accumulators (per core)
        i = pl.program_id(1)

        @pl.when(i == 0)
        def _init():
            acc_fr_ref[...] = jnp.zeros_like(acc_fr_ref)
            acc_rf_ref[...] = jnp.zeros_like(acc_rf_ref)

        pr = p_r_ref[...].astype(jnp.float32)
        pf = p_f_ref[...].astype(jnp.float32)
        cw = c_ref[...]
        cf = cw[:, 0:1]
        cr = cw[:, 1:2]

        tiny = jnp.float32(jnp.finfo(jnp.float32).tiny)
        # maximum(p, tiny) keeps xlogy(0,0)=0 exactly (0 * finite log = 0) and
        # drops the compare+select of the previous where-based formulation.
        log_pr = jnp.log(jnp.maximum(pr, tiny))
        log_pf = jnp.log(jnp.maximum(pf, tiny))
        cross = pr * pf                                   # shared term

        term_fr = cf * (pf * log_pf - cross)              # -> L_f_r numerator
        term_rf = cr * (pr * log_pr - cross)              # -> L_r_f numerator

        if needs_row_mask or has_dup_tiles:
            t_logical = pl.program_id(0) * pl.num_programs(1) + i
            cond = None
            if has_dup_tiles:
                # grid steps past the last real tile are clamped duplicates
                cond = t_logical < total_tiles
            if needs_row_mask:
                t_actual = jnp.minimum(t_logical, total_tiles - 1)
                row_ids = t_actual * tile_rows + jax.lax.broadcasted_iota(
                    jnp.int32, (tile_rows, n_cols), 0)
                rmask = row_ids < n_rows
                cond = rmask if cond is None else (cond & rmask)
            term_fr = jnp.where(cond, term_fr, 0.0)
            term_rf = jnp.where(cond, term_rf, 0.0)

        acc_fr_ref[...] += term_fr
        acc_rf_ref[...] += term_rf

        @pl.when(i == pl.num_programs(1) - 1)
        def _finalize():
            out_fr_ref[...] = jnp.broadcast_to(
                jnp.sum(acc_fr_ref[...]), (1, 1, 128)).astype(jnp.float32)
            out_rf_ref[...] = jnp.broadcast_to(
                jnp.sum(acc_rf_ref[...]), (1, 1, 128)).astype(jnp.float32)

    return kernel


def amd_forward(q_r, q_f, p_r, c_r, p_f, c_f, *, max_rows_per_tile=None,
                vmem_block_budget_bytes=20 * 1024 * 1024):
    """Pallas implementation of AMD.forward; returns (L_f_r, L_r_f)."""
    # TODO(synk): Q_r / Q_f are only used for their lengths in the reference
    # module; we assume len(Q_r) == len(Q_f) == len(p_*) == len(c_*).
    n = int(p_r.shape[0])
    assert q_r.shape[0] == n and q_f.shape[0] == n
    assert p_f.shape[0] == n and c_r.shape[0] == n and c_f.shape[0] == n

    def as_p(a):
        a = jnp.asarray(a)
        if (not jnp.issubdtype(a.dtype, jnp.floating)) or a.dtype.itemsize > 4:
            a = a.astype(jnp.float32)
        return a.reshape(n, -1)

    pr = as_p(p_r)
    pf = as_p(p_f)
    num_el = pr.shape[1]          # 'mean' reduction divisor (original C)
    assert pf.shape[1] == num_el

    cf = jnp.asarray(c_f, jnp.float32).reshape(n)
    cr = jnp.asarray(c_r, jnp.float32).reshape(n)
    cw = jnp.stack([cf, cr], axis=-1)          # (n, 2): one narrow DMA stream

    # ---- VMEM-budgeted row tile -------------------------------------------
    # Conservative estimate: 2x double-buffered p blocks, 2 f32 accumulators,
    # and ~6 f32 elementwise temporaries live at peak, plus the c block.
    bytes_per_row = (2 * (pr.dtype.itemsize + pf.dtype.itemsize) * num_el
                     + (2 + 6) * 4 * num_el + 32)
    tn = max(8, (int(vmem_block_budget_bytes) // bytes_per_row) // 8 * 8)
    tn = min(tn, ((n + 7) // 8) * 8)
    if max_rows_per_tile is not None:
        tn = min(tn, max(8, (int(max_rows_per_tile) // 8) * 8))

    total_tiles = -(-n // tn)
    num_chunks = 2 if total_tiles >= 2 else 1      # v7x megacore split
    tiles_per_chunk = -(-total_tiles // num_chunks)

    needs_row_mask = (total_tiles * tn != n)
    has_dup_tiles = (num_chunks * tiles_per_chunk != total_tiles)
    last_tile = total_tiles - 1

    def tile_idx(c, i):
        # Clamp so every DMA'd block lies within the array; duplicated
        # (clamped) tiles are zero-masked inside the kernel.
        return jnp.minimum(c * tiles_per_chunk + i, last_tile)

    def p_spec():
        return pl.BlockSpec((tn, num_el), lambda c, i: (tile_idx(c, i), 0))

    def out_spec():
        return pl.BlockSpec((1, 1, 128), lambda c, i: (c, 0, 0))

    c_spec = pl.BlockSpec((tn, 2), lambda c, i: (tile_idx(c, i), 0))

    kernel = _make_amd_kernel(
        n_rows=n, tile_rows=tn, n_cols=num_el, total_tiles=total_tiles,
        needs_row_mask=needs_row_mask, has_dup_tiles=has_dup_tiles)

    out_fr, out_rf = pl.pallas_call(
        kernel,
        out_shape=(jax.ShapeDtypeStruct((num_chunks, 1, 128), jnp.float32),
                   jax.ShapeDtypeStruct((num_chunks, 1, 128), jnp.float32)),
        grid_spec=pltpu.PrefetchScalarGridSpec(
            num_scalar_prefetch=0,
            grid=(num_chunks, tiles_per_chunk),
            in_specs=[p_spec(), p_spec(), c_spec],
            out_specs=[out_spec(), out_spec()],
            scratch_shapes=[pltpu.VMEM((tn, num_el), jnp.float32),
                            pltpu.VMEM((tn, num_el), jnp.float32)],
        ),
        compiler_params=pltpu.CompilerParams(
            dimension_semantics=("parallel", "arbitrary"),
            vmem_limit_bytes=32 * 1024 * 1024),
    )(pr, pf, cw)

    # Final normalisation in the wrapper: fold the 1/C 'mean' divisor and the
    # sum(c_*) weights into one divide (sums of (n,) arrays are trivially XLA).
    sum_cf = jnp.sum(cf)
    sum_cr = jnp.sum(cr)
    l_f_r = jnp.sum(out_fr[:, 0, 0]) / (sum_cf * jnp.float32(num_el))
    l_r_f = jnp.sum(out_rf[:, 0, 0]) / (sum_cr * jnp.float32(num_el))
    return l_f_r, l_r_f


def _amd_reference(p_r, p_f, c_r, c_f):
    """Pure-JAX reference mirroring torch.nn.KLDivLoss(reduction='mean')."""
    n = p_r.shape[0]
    pr = jnp.asarray(p_r, jnp.float32).reshape(n, -1)
    pf = jnp.asarray(p_f, jnp.float32).reshape(n, -1)
    cr = jnp.asarray(c_r, jnp.float32).reshape(n)
    cf = jnp.asarray(c_f, jnp.float32).reshape(n)

    def kldiv_mean(inp, tgt):
        xlogx = jnp.where(tgt == 0.0, 0.0,
                          tgt * jnp.log(jnp.where(tgt == 0.0, 1.0, tgt)))
        return jnp.mean(xlogx - tgt * inp, axis=-1)

    l_f_r = jnp.sum(cf * kldiv_mean(pr, pf)) / jnp.sum(cf)
    l_r_f = jnp.sum(cr * kldiv_mean(pf, pr)) / jnp.sum(cr)
    return l_f_r, l_r_f


if __name__ == "__main__":
    key = jax.random.PRNGKey(0)

    # (n, num_classes, feat, tile override, p dtype)
    configs = [
        (13, 10, 4, 8, jnp.float32),    # 2 tiles -> 2 parallel chunks, ragged last tile
        (70, 24, 4, 16, jnp.float32),   # 5 tiles -> 2x3 grid: clamped duplicate tile + ragged
        (24, 32, 4, None, jnp.bfloat16),  # single tile/chunk, bf16 DMA + f32 in-kernel math
    ]

    for idx, (n, num_classes, feat, tile, pdt) in enumerate(configs):
        key, *ks = jax.random.split(key, 7)
        # Q_r / Q_f: only their length matters to the reference module.
        q_r = jax.random.normal(ks[0], (n, feat), jnp.float32)
        q_f = jax.random.normal(ks[1], (n, feat), jnp.float32)
        p_r = jax.nn.softmax(
            jax.random.normal(ks[2], (n, num_classes), jnp.float32), axis=-1).astype(pdt)
        p_f = jax.nn.softmax(
            jax.random.normal(ks[3], (n, num_classes), jnp.float32), axis=-1).astype(pdt)
        c_r = jax.random.uniform(ks[4], (n,), jnp.float32, minval=0.1, maxval=1.0)
        c_f = jax.random.uniform(ks[5], (n,), jnp.float32, minval=0.1, maxval=1.0)

        l_f_r, l_r_f = amd_forward(q_r, q_f, p_r, c_r, p_f, c_f,
                                   max_rows_per_tile=tile)
        l_f_r, l_r_f = jax.block_until_ready((l_f_r, l_r_f))

        ref_f_r, ref_r_f = _amd_reference(p_r, p_f, c_r, c_f)
        assert np.allclose(float(l_f_r), float(ref_f_r), rtol=2e-5, atol=1e-6), \
            (idx, float(l_f_r), float(ref_f_r))
        assert np.allclose(float(l_r_f), float(ref_r_f), rtol=2e-5, atol=1e-6), \
            (idx, float(l_r_f), float(ref_r_f))
        assert l_f_r.dtype == jnp.float32 and l_r_f.dtype == jnp.float32

    print("KERNEL_OK")
</pallas_src>

<mosaic_0001>
module attributes {stable_mosaic.version = 11 : i64} {
  func.func @kernel(%arg0: i32, %arg1: i32, %arg2: memref<8x10xf32, #tpu.memory_space<vmem>>, %arg3: memref<8x10xf32, #tpu.memory_space<vmem>>, %arg4: memref<8x2xf32, #tpu.memory_space<vmem>>, %arg5: memref<1x1x128xf32, #tpu.memory_space<vmem>>, %arg6: memref<1x1x128xf32, #tpu.memory_space<vmem>>, %arg7: memref<8x10xf32, #tpu.memory_space<vmem>>, %arg8: memref<8x10xf32, #tpu.memory_space<vmem>>) attributes {dimension_semantics = [#tpu.dimension_semantics<parallel>, #tpu.dimension_semantics<arbitrary>], iteration_bounds = array<i64: 2, 1>, scalar_prefetch = 0 : i64, scratch_operands = 2 : i64, tpu.core_type = #tpu.core_type<tc>, window_params = [{transform_indices = @transform_0, window_bounds = array<i64: 8, 10>}, {transform_indices = @transform_1, window_bounds = array<i64: 8, 10>}, {transform_indices = @transform_2, window_bounds = array<i64: 8, 2>}, {transform_indices = @transform_3, window_bounds = array<i64: 1, 1, 128>}, {transform_indices = @transform_4, window_bounds = array<i64: 1, 1, 128>}]} {
    %c0_i32 = arith.constant 0 : i32
    %0 = arith.cmpi eq, %arg1, %c0_i32 : i32
    %1 = arith.extui %0 : i1 to i32
    %c0_i32_0 = arith.constant 0 : i32
    %2 = arith.cmpi ne, %1, %c0_i32_0 : i32
    scf.if %2 {
      %cst_20 = arith.constant 0.000000e+00 : f32
      %45 = vector.broadcast %cst_20 : f32 to vector<8x10xf32>
      %c0_21 = arith.constant 0 : index
      %c0_22 = arith.constant 0 : index
      %46 = vector.load %arg7[%c0_21, %c0_22] : memref<8x10xf32, #tpu.memory_space<vmem>>, vector<8x10xf32>
      tpu.vector_store %arg7[%c0_21, %c0_22], %45 {strides = array<i32>} : memref<8x10xf32, #tpu.memory_space<vmem>>, vector<8x10xf32>,
      %cst_23 = arith.constant 0.000000e+00 : f32
      %47 = vector.broadcast %cst_23 : f32 to vector<8x10xf32>
      %c0_24 = arith.constant 0 : index
      %c0_25 = arith.constant 0 : index
      %48 = vector.load %arg8[%c0_24, %c0_25] : memref<8x10xf32, #tpu.memory_space<vmem>>, vector<8x10xf32>
      tpu.vector_store %arg8[%c0_24, %c0_25], %47 {strides = array<i32>} : memref<8x10xf32, #tpu.memory_space<vmem>>, vector<8x10xf32>,
    } else {
    }
    %c0 = arith.constant 0 : index
    %c0_1 = arith.constant 0 : index
    %3 = vector.load %arg2[%c0, %c0_1] : memref<8x10xf32, #tpu.memory_space<vmem>>, vector<8x10xf32>
    %c0_2 = arith.constant 0 : index
    %c0_3 = arith.constant 0 : index
    %4 = vector.load %arg3[%c0_2, %c0_3] : memref<8x10xf32, #tpu.memory_space<vmem>>, vector<8x10xf32>
    %c0_4 = arith.constant 0 : index
    %c0_5 = arith.constant 0 : index
    %5 = vector.load %arg4[%c0_4, %c0_5] : memref<8x2xf32, #tpu.memory_space<vmem>>, vector<8x2xf32>
    %6 = vector.extract_strided_slice %5 {offsets = [0, 0], sizes = [8, 1], strides = [1, 1]} : vector<8x2xf32> to vector<8x1xf32>
    %7 = vector.extract_strided_slice %5 {offsets = [0, 1], sizes = [8, 1], strides = [1, 1]} : vector<8x2xf32> to vector<8x1xf32>
    %cst = arith.constant 1.17549435E-38 : f32
    %8 = vector.broadcast %cst : f32 to vector<8x10xf32>
    %9 = arith.maximumf %3, %8 : vector<8x10xf32>
    %10 = math.log %9 : vector<8x10xf32>
    %cst_6 = arith.constant 1.17549435E-38 : f32
    %11 = vector.broadcast %cst_6 : f32 to vector<8x10xf32>
    %12 = arith.maximumf %4, %11 : vector<8x10xf32>
    %13 = math.log %12 : vector<8x10xf32>
    %14 = arith.mulf %3, %4 : vector<8x10xf32>
    %15 = arith.mulf %4, %13 : vector<8x10xf32>
    %16 = arith.subf %15, %14 : vector<8x10xf32>
    %17 = vector.broadcast %6 : vector<8x1xf32> to vector<8x10xf32>
    %18 = arith.mulf %17, %16 : vector<8x10xf32>
    %19 = arith.mulf %3, %10 : vector<8x10xf32>
    %20 = arith.subf %19, %14 : vector<8x10xf32>
    %21 = vector.broadcast %7 : vector<8x1xf32> to vector<8x10xf32>
    %22 = arith.mulf %21, %20 : vector<8x10xf32>
    %c1_i32 = arith.constant 1 : i32
    %23 = arith.muli %arg0, %c1_i32 : i32
    %24 = arith.addi %23, %arg1 : i32
    %c1_i32_7 = arith.constant 1 : i32
    %25 = arith.minsi %24, %c1_i32_7 : i32
    %c8_i32 = arith.constant 8 : i32
    %26 = arith.muli %25, %c8_i32 : i32
    %27 = tpu.iota {dimensions = array<i32: 0>} : vector<8x10xi32>
    %28 = vector.broadcast %26 : i32 to vector<8x10xi32>
    %29 = arith.addi %28, %27 : vector<8x10xi32>
    %c13_i32 = arith.constant 13 : i32
    %30 = vector.broadcast %c13_i32 : i32 to vector<8x10xi32>
    %31 = arith.cmpi slt, %29, %30 : vector<8x10xi32>
    %cst_8 = arith.constant 0.000000e+00 : f32
    %32 = vector.broadcast %cst_8 : f32 to vector<8x10xf32>
    %33 = arith.select %31, %18, %32 : vector<8x10xi1>, vector<8x10xf32>
    %cst_9 = arith.constant 0.000000e+00 : f32
    %34 = vector.broadcast %cst_9 : f32 to vector<8x10xf32>
    %35 = arith.select %31, %22, %34 : vector<8x10xi1>, vector<8x10xf32>
    %c0_10 = arith.constant 0 : index
    %c0_11 = arith.constant 0 : index
    %36 = vector.load %arg7[%c0_10, %c0_11] : memref<8x10xf32, #tpu.memory_space<vmem>>, vector<8x10xf32>
    %37 = arith.addf %36, %33 : vector<8x10xf32>
    %c0_12 = arith.constant 0 : index
    %c0_13 = arith.constant 0 : index
    %38 = vector.load %arg7[%c0_12, %c0_13] : memref<8x10xf32, #tpu.memory_space<vmem>>, vector<8x10xf32>
    tpu.vector_store %arg7[%c0_12, %c0_13], %37 {strides = array<i32>} : memref<8x10xf32, #tpu.memory_space<vmem>>, vector<8x10xf32>,
    %c0_14 = arith.constant 0 : index
    %c0_15 = arith.constant 0 : index
    %39 = vector.load %arg8[%c0_14, %c0_15] : memref<8x10xf32, #tpu.memory_space<vmem>>, vector<8x10xf32>
    %40 = arith.addf %39, %35 : vector<8x10xf32>
    %c0_16 = arith.constant 0 : index
    %c0_17 = arith.constant 0 : index
    %41 = vector.load %arg8[%c0_16, %c0_17] : memref<8x10xf32, #tpu.memory_space<vmem>>, vector<8x10xf32>
    tpu.vector_store %arg8[%c0_16, %c0_17], %40 {strides = array<i32>} : memref<8x10xf32, #tpu.memory_space<vmem>>, vector<8x10xf32>,
    %c0_i32_18 = arith.constant 0 : i32
    %42 = arith.cmpi eq, %arg1, %c0_i32_18 : i32
    %43 = arith.extui %42 : i1 to i32
    %c0_i32_19 = arith.constant 0 : i32
    %44 = arith.cmpi ne, %43, %c0_i32_19 : i32
    scf.if %44 {
      %c0_20 = arith.constant 0 : index
      %c0_21 = arith.constant 0 : index
      %45 = vector.load %arg7[%c0_20, %c0_21] : memref<8x10xf32, #tpu.memory_space<vmem>>, vector<8x10xf32>
      %46 = vector.shape_cast %45 : vector<8x10xf32> to vector<1x8x10xf32>
      %cst_22 = arith.constant dense<0.000000e+00> : vector<1xf32>
      %47 = vector.multi_reduction <add>, %46, %cst_22 [1, 2] : vector<1x8x10xf32> to vector<1xf32>
      %48 = vector.shape_cast %47 : vector<1xf32> to vector<1x1x1xf32>
      %49 = vector.extract %48[0, 0, 0] : f32 from vector<1x1x1xf32>
      %50 = vector.broadcast %49 : f32 to vector<1x1x128xf32>
      %c0_23 = arith.constant 0 : index
      %c0_24 = arith.constant 0 : index
      %c0_25 = arith.constant 0 : index
      %51 = vector.load %arg5[%c0_23, %c0_24, %c0_25] : memref<1x1x128xf32, #tpu.memory_space<vmem>>, vector<1x1x128xf32>
      tpu.vector_store %arg5[%c0_23, %c0_24, %c0_25], %50 {strides = array<i32>} : memref<1x1x128xf32, #tpu.memory_space<vmem>>, vector<1x1x128xf32>,
      %c0_26 = arith.constant 0 : index
      %c0_27 = arith.constant 0 : index
      %52 = vector.load %arg8[%c0_26, %c0_27] : memref<8x10xf32, #tpu.memory_space<vmem>>, vector<8x10xf32>
      %53 = vector.shape_cast %52 : vector<8x10xf32> to vector<1x8x10xf32>
      %cst_28 = arith.constant dense<0.000000e+00> : vector<1xf32>
      %54 = vector.multi_reduction <add>, %53, %cst_28 [1, 2] : vector<1x8x10xf32> to vector<1xf32>
      %55 = vector.shape_cast %54 : vector<1xf32> to vector<1x1x1xf32>
      %56 = vector.extract %55[0, 0, 0] : f32 from vector<1x1x1xf32>
      %57 = vector.broadcast %56 : f32 to vector<1x1x128xf32>
      %c0_29 = arith.constant 0 : index
      %c0_30 = arith.constant 0 : index
      %c0_31 = arith.constant 0 : index
      %58 = vector.load %arg6[%c0_29, %c0_30, %c0_31] : memref<1x1x128xf32, #tpu.memory_space<vmem>>, vector<1x1x128xf32>
      tpu.vector_store %arg6[%c0_29, %c0_30, %c0_31], %57 {strides = array<i32>} : memref<1x1x128xf32, #tpu.memory_space<vmem>>, vector<1x1x128xf32>,
    } else {
    }
    return
  }
  func.func @transform_0(%arg0: i32, %arg1: i32) -> (i32, i32) {
    %c1_i32 = arith.constant 1 : i32
    %0 = arith.muli %arg0, %c1_i32 : i32
    %1 = arith.addi %0, %arg1 : i32
    %c1_i32_0 = arith.constant 1 : i32
    %2 = arith.minsi %1, %c1_i32_0 : i32
    %c0_i32 = arith.constant 0 : i32
    %c0_i32_1 = arith.constant 0 : i32
    return %2, %c0_i32 : i32, i32
  }
  func.func @transform_1(%arg0: i32, %arg1: i32) -> (i32, i32) {
    %c1_i32 = arith.constant 1 : i32
    %0 = arith.muli %arg0, %c1_i32 : i32
    %1 = arith.addi %0, %arg1 : i32
    %c1_i32_0 = arith.constant 1 : i32
    %2 = arith.minsi %1, %c1_i32_0 : i32
    %c0_i32 = arith.constant 0 : i32
    %c0_i32_1 = arith.constant 0 : i32
    return %2, %c0_i32 : i32, i32
  }
  func.func @transform_2(%arg0: i32, %arg1: i32) -> (i32, i32) {
    %c1_i32 = arith.constant 1 : i32
    %0 = arith.muli %arg0, %c1_i32 : i32
    %1 = arith.addi %0, %arg1 : i32
    %c1_i32_0 = arith.constant 1 : i32
    %2 = arith.minsi %1, %c1_i32_0 : i32
    %c0_i32 = arith.constant 0 : i32
    %c0_i32_1 = arith.constant 0 : i32
    return %2, %c0_i32 : i32, i32
  }
  func.func @transform_3(%arg0: i32, %arg1: i32) -> (i32, i32, i32) {
    %c0_i32 = arith.constant 0 : i32
    %c0_i32_0 = arith.constant 0 : i32
    %c0_i32_1 = arith.constant 0 : i32
    return %arg0, %c0_i32, %c0_i32_0 : i32, i32, i32
  }
  func.func @transform_4(%arg0: i32, %arg1: i32) -> (i32, i32, i32) {
    %c0_i32 = arith.constant 0 : i32
    %c0_i32_0 = arith.constant 0 : i32
    %c0_i32_1 = arith.constant 0 : i32
    return %arg0, %c0_i32, %c0_i32_0 : i32, i32, i32
  }
}

</mosaic_0001>

<bundles_post_ra>
// kernel: tpu_custom_call.1
= control target key start
LH: loop header
LB: loop body
LE: loop exit
PB: predicated region body
PF: predicated region fallthrough
CT: control target
= control target key end

     0   :  { %s1066_s0 = inlined_call_operand.vmem [shape: f32[13,10], index: 0, kind: input, shape index: {}]   ;;  %s1067_s1 = inlined_call_operand.hbm [shape: f32[13,10], index: 1, kind: input, shape index: {}]   ;;  %s1068_s2 = inlined_call_operand.vmem [shape: f32[13,2], index: 2, kind: input, shape index: {}]   ;;  %s1069_s3 = inlined_call_operand.hbm [shape: f32[2,1,128], index: 3, kind: output, shape index: {0}]   ;;  %s1070_s4 = inlined_call_operand.hbm [shape: f32[2,1,128], index: 4, kind: output, shape index: {1}]  }
   0x1   :  { %1073 = sst [smem:[#allocation15_spill]] %s1066_s0 }
   0x2   :  { %10 = vsyncpa [#allocation5], 0 }
   0x3   :  { %12 = vsyncpa [#allocation5 + $0x1], 0 }
   0x4   :  { %13 = vsyncpa [#allocation6], 0 }
   0x5   :  { %15 = vsyncpa [#allocation6 + $0x1], 0 }
   0x6   :  { %16 = vsyncpa [#allocation9], 0 }
   0x7   :  { %18 = vsyncpa [#allocation9 + $0x1], 0  ;;  %s880_s15 = smov 0   ;;  %s882_s16 = smov 0  }
   0x8   :  { %s884_s17 = smov 0   ;;  %s886_s18 = smov 0  }
   0x9   :  { %s888_s19 = smov 0   ;;  %s890_s20 = smov 0  }
   0xa   :  { %s892_s21 = smov 0   ;;  %s894_s22 = smov 0  }
   0xb   :  { %s896_s23 = smov 0  }
   0xc LB: > { %1074 = sst [smem:[#allocation13_spill]] %s846_s22  ;;  %s559_s24 = sadd.s32 4294967295, %s850_s23   ;;  %s850_s23 = sphi %s896_s23, %s24_s23   ;;  %s846_s22 = sphi %s894_s22, %s1082_s22   ;;  %s842_s21 = sphi %s892_s21, %s1081_s21   ;;  %s838_s20 = sphi %s890_s20, %s1088_s20   ;;  %s834_s19 = sphi %s888_s19, %s1087_s19   ;;  %s830_s18 = sphi %s886_s18, %s1086_s18   ;;  %s826_s17 = sphi %s884_s17, %s1085_s17   ;;  %s822_s16 = sphi %s882_s16, %s1084_s16   ;;  %s818_s15 = sphi %s880_s15, %s1083_s15  }
   0xd   : > { %s560_s25 = sadd.s32 4294967294, %s850_s23   ;;  %s36_s26 = sadd.s32 1, %s846_s22 }
   0xe   : > { %p73_p0 = scmp.lt.s32.totalorder %s846_s22, 1  ;;  %p38_p1 = scmp.ge.s32.totalorder %s36_s26, 2 }
   0xf   : > { %s81_s27 = sadd.s32 1, %s838_s20  ;;  %p88_p2 = scmp.ne.s32.totalorder %s838_s20, %s834_s19 }
  0x10   : > { %s929_s28 = scalar_select %p73_p0, %s846_s22, 1 }
  0x11   : > { %s1090_s26 = smov (%p38_p1, %s36_s26), 0  ;;  %p89_p3 = scmp.eq.s32.totalorder %s850_s23, 0 }
  0x12   : > { %1075 = sst [smem:[#allocation14_spill]] %s1090_s26  ;;  %p76_p4 = scmp.lt.s32.totalorder %s1090_s26, 1 }
  0x13   : > { %p94_p5 = scmp.ne.s32.totalorder %s834_s19, %s830_s18  ;;  %p938_p6 = por %p89_p3, %p88_p2 }
  0x14   : > { %p95_p7 = scmp.eq.s32.totalorder %s559_s24, 0  ;;  %s136_s6 = ssub.s32 %s846_s22, %s1090_s26 }
  0x15   : > { %s77_s30 = scalar_select %p76_p4, %s1090_s26, 1 }
  0x16   : > { %p943_p8 = por %p95_p7, %p94_p5  ;;  %p137_p9 = scmp.eq.s32.totalorder %s136_s6, 0 }
  0x17   : > { %s78_s7 = ssub.s32 %s929_s28, %s77_s30  ;;  %s139_s8 = sadd.s32 1, %s826_s17 }
  0x18   : > { %p79_p10 = scmp.eq.s32.totalorder %s78_s7, 0  ;;  %p149_p11 = scmp.ne.s32.totalorder %s826_s17, %s822_s16 }
  0x19   : > { %s952_s9 = scalar_select %p137_p9, %s826_s17, %s139_s8  }
  0x1a   : > { %s955_s10 = scalar_select %p79_p10, %s838_s20, %s81_s27  }
  0x1b   : > { %p150_p12 = scmp.eq.s32.totalorder %s559_s24, 1  ;;  %p155_p13 = scmp.ne.s32.totalorder %s822_s16, %s818_s15 }
  0x1c   : > { %p156_p0 = scmp.eq.s32.totalorder %s560_s25, 1  ;;  %p562_p2 = scmp.ge.s32.totalorder %s850_s23, 2 }
  0x1d   : > { %p961_p1 = por %p150_p12, %p149_p11  ;;  %p599_p4 = scmp.lt.s32.totalorder %s850_s23, 2 }
  0x1e   : > { %p966_p3 = por %p156_p0, %p155_p13  ;;  %s215_s13 = sand.u32 1, %s838_s20  }
  0x1f   : > { %s564_s14 = sshll.u32 %s929_s28, 3  ;;  %s563_s18 = sshll.u32 %s215_s13, 3 }
  0x20   : > { %s226_s30 = scalar_lea.hbm %s1067_s1, %s564_s14  ;;  %s219_s25 = scalar_lea.vmem [#allocation4], %s563_s18 }
  0x21   : > { %s228_s6 = sshll.u32 %s226_s30, 4  ;;  %s230_s7 = sshll.u32 %s219_s25, 4  ;;  %s229_s6 = int_to_ptr.hbm [resolvable:$true] %s228_s6  ;;  %s231_s7 = int_to_ptr.vmem [resolvable:$true] %s230_s7 }
  0x22   : > { %p589_p5 = pnand %p599_p4, %p938_p6  ;;  %p565_p7 = scmp.ge.s32.totalorder %s850_s23, 1 }
  0x23   : > { %p248_p9 = scmp.lt.s32.totalorder %s850_s23, 3  ;;  %s216_s8 = scalar_lea.sflag [#allocation5], %s215_s13 }
  0x24   : > { %591 = dma.hbm_to_vmem [thread:$0]  (!%p589_p5), %s229_s6, 128, %s231_s7, %s216_s8  }
  0x25   : > { %p249_p10 = pnand %p565_p7, %p248_p9 }
  0x26   : > { %s254_s28 = sand.u32 (!%p249_p10), 1, %s834_s19  }
  0x27   : > { %252 = sbr.rel (%p249_p10) target bundleno = 379 (0x17b), region = 32  ;;  %s566_s26 = sshll.u32 (!%p249_p10), %s254_s28, 3 }
  0x28   : > { %s255_s22 = scalar_lea.sflag (!%p249_p10), [#allocation5], %s254_s28  ;;  %s258_s27 = scalar_lea.vmem (!%p249_p10), [#allocation4], %s566_s26 }
  0x2c   : > { %805 = dma.done.wait (%p943_p8), %s255_s22, 128  }
  0x2d   : > { %807 = vsyncadd (%p943_p8), %s255_s22, 4294967168  ;;  %p302_p6 = scmp.lt.s32.totalorder %s842_s21, 1  ;;  %vm328_vm0 = vcmask 80896   ;;  %v852_v0 = vmov 0   ;;  %v853_v1 = vmov 0.0   ;;  %v854_v3 = vmov 1   ;;  %s416_s28 = scalar_lea.hbm %s1069_s3, %s842_s21 }
  0x2e   : > { %676 = vset.pattern.permute.xlu0 %v852_v0  ;;  %329 = vst.msk [vmem:[#allocation2] sm:$0xff] %vm328_vm0, %v853_v1  ;;  %v332_v4 = vld [vmem:[%s258_s27] sm:$0xff]  ;;  %s1080_s0 = sld [smem:[#allocation15_spill]]  ;;  %v360_v9 = vlaneseq  ;;  %s1000_s25 = sand.u32 1, %s822_s16  }
  0x2f   : > { %s303_s29 = scalar_select %p302_p6, %s842_s21, 1  ;;  %330 = vst.msk [vmem:[#allocation3] sm:$0xff] %vm328_vm0, %v853_v1  ;;  %v337_v5 = vmax.f32 %v332_v4, 1.1754944e-38 }
  0x30   : > { %v361_v11 = vshrl.u32 %v360_v9, 7  ;;  %s294_s27 = scalar_lea.vmem [#allocation7], %s1000_s25  ;;  %s404_s22 = scalar_lea.sflag [#allocation6], %s1000_s25 }
  0x31   : > { %s305_s13 = scalar_select %p302_p6, %s303_s29, 1  ;;  %678 = vlog2.f32 %v337_v5 }
  0x32   : > { %s575_s6 = sshll.u32 %s303_s29, 3  ;;  %s418_s29 = sshll.u32 %s294_s27, 4  ;;  %s419_s29 = int_to_ptr.vmem [resolvable:$true] %s418_s29 }
  0x33   : > { %s570_s14 = sshll.u32 %s305_s13, 3  ;;  %v362_v12 = vstv %s575_s6  ;;  %s420_s13 = sshll.u32 %s416_s28, 4  ;;  %s421_s13 = int_to_ptr.hbm [resolvable:$true] %s420_s13 }
  0x34   : > { %s320_s24 = scalar_lea.vmem %s1068_s2, %s570_s14  ;;  %s307_s30 = scalar_lea.vmem %s1080_s0, %s570_s14  ;;  %v363_v16 = vadd.s32 %v362_v12, %v361_v11 }
  0x35   : > { %v333_v2 = vld [vmem:[%s320_s24] sm:$0xff]  ;;  %s429_s24 = scalar_lea.hbm %s1070_s4, %s842_s21  ;;  %s726_s5 = sshra.s32 %s421_s13, 4  ;;  %s727_s5 = int_to_ptr.hbm [resolvable:$true] %s726_s5 }
  0x36   : > { %345 = vperm.xlu0 %676, %v333_v2   ;;  %v331_v6 = vld [vmem:[%s307_s30] sm:$0xff]  ;;  %vm364_vm1 = vcmp.lt.s32.totalorder %v363_v16, 13  ;;  %v371_v28 = vld [vmem:[#allocation3] sm:$0xff]  ;;  %s728_s30 = scalar_lea.hbm %s727_s5, 1  ;;  %s732_s8 = scalar_lea.hbm %s1069_s3, 2 }
  0x37   : > { %v334_v7 = vmax.f32 %v331_v6, 1.1754944e-38  ;;  %v679_v8 = vpop.eup %678  ;;  %v340_v13 = vmul.f32 %v332_v4, %v331_v6  ;;  %v367_v21 = vld [vmem:[#allocation2] sm:$0xff]  ;;  %p729_p8 = scmp.ne.s32.totalorder %s727_s5, %s728_s30  ;;  %p733_p13 = scmp.lt.s32.totalorder %s727_s5, %s1069_s3 }
  0x38   : > { %v339_v10 = vmul.f32 0.6931472, %v679_v8  ;;  %p734_p0 = scmp.lt.s32.totalorder %s732_s8, %s728_s30 }
  0x39   : > { %680 = vlog2.f32 %v334_v7  ;;  %p730_p11 = pnand %p729_p8, %p961_p1 }
  0x3a   : > { %v341_v14 = vmul.f32 %v339_v10, %v332_v4  ;;  %p735_p4 = por %p734_p0, %p733_p13 }
  0x3b   : > { %p731_p12 = pneg %p730_p11 }
  0x3c   : > { %v342_v17 = vsub.f32 %v341_v14, %v340_v13 }
  0x3d   : > { %p736_p5 = pnand %p735_p4, %p731_p12 }
  0x3e   : > { %677 = vset.pattern.permute.xlu0 %v854_v3 }
  0x3f   : > { %352 = vperm.xlu0 %677, %v333_v2   ;;  %v681_v15 = vpop.eup %680 }
  0x40   : > { %v336_v18 = vmul.f32 0.6931472, %v681_v15 }
  0x42   : > { %v349_v22 = vmul.f32 %v336_v18, %v331_v6 }
  0x44   : > { %v350_v25 = vsub.f32 %v349_v22, %v340_v13 }
  0xa8   : > { %v346_v19 = vpop.permute.xlu0 %345 }
  0xa9   : > { %v348_v20 = vmul.f32 %v346_v19, %v342_v17 }
  0xab   : > { %v365_v23 = vsel %vm364_vm1, %v348_v20, 0.0 }
  0xac   : > { %v368_v24 = vadd.f32 %v367_v21, %v365_v23 }
  0xae   : > { %370 = vst.msk [vmem:[#allocation2] sm:$0xff] %vm328_vm0, %v368_v24 }
  0xb1   : > { %v353_v26 = vpop.permute.xlu0 %352 }
  0xb2   : > { %v355_v27 = vmul.f32 %v353_v26, %v350_v25 }
  0xb4   : > { %v366_v29 = vsel %vm364_vm1, %v355_v27, 0.0 }
  0xb5   : > { %v372_v30 = vadd.f32 %v371_v28, %v366_v29  ;;  %v377_v31 = vld [vmem:[#allocation2] sm:$0xff] }
  0xb6   : > { %v378_v32 = vsel %vm328_vm0, %v377_v31, 0.0 }
  0xb7   : > { %373 = vst.msk [vmem:[#allocation3] sm:$0xff] %vm328_vm0, %v372_v30  ;;  %379 = vadd.xlane.f32.xlu1 %v378_v32 }
  0xbe   : > { %v390_v33 = vld [vmem:[#allocation3] sm:$0xff] }
  0xbf   : > { %v391_v34 = vsel %vm328_vm0, %v390_v33, 0.0 }
  0xc0   : > { %392 = vadd.xlane.f32.xlu1 %v391_v34 }
 0x12a   : > { %v380_v35 = vpop.xlane.xlu1 %379 }
 0x12b   : > { %v381_v36 = vrot.slane %v380_v35, 4 }
 0x12d   : > { %v382_v37 = vadd.f32 %v381_v36, %v380_v35 }
 0x12f   : > { %v383_v38 = vrot.slane %v382_v37, 2 }
 0x131   : > { %v384_v39 = vadd.f32 %v383_v38, %v382_v37 }
 0x133   : > { %v393_v40 = vpop.xlane.xlu1 %392  ;;  %v385_v41 = vrot.slane %v384_v39, 1 }
 0x134   : > { %v394_v42 = vrot.slane %v393_v40, 4 }
 0x135   : > { %v386_v43 = vadd.f32 %v385_v41, %v384_v39 }
 0x136   : > { %v395_v44 = vadd.f32 %v394_v42, %v393_v40 }
 0x137   : > { %578 = vpush %v386_v43 }
 0x138   : > { %v396_v45 = vrot.slane %v395_v44, 2 }
 0x13a   : > { %v397_v46 = vadd.f32 %v396_v45, %v395_v44 }
 0x13c   : > { %v398_v47 = vrot.slane %v397_v46, 1 }
 0x13e   : > { %v399_v48 = vadd.f32 %v398_v47, %v397_v46 }
 0x140   : > { %580 = vpush %v399_v48 }
 0x168   : > { %s579_s14 = spop %578 }
 0x169   : > { %v388_v49 = vstv %s579_s14 }
 0x16a   : > { %389 = vst [vmem:[%s294_s27] sm:$0x1] %v388_v49 }
 0x16b   : > { %739 = shalt.err (!%p736_p5)
}
 0x16c   : > { %584 = dma.vmem_to_hbm [thread:$0]  (%p961_p1), %s419_s29, 16, %s421_s13, %s404_s22  }
 0x16d   : > { %s300_s21 = scalar_lea.vmem [#allocation8], %s1000_s25  ;;  %s433_s14 = sshll.u32 %s429_s24, 4  ;;  %s434_s14 = int_to_ptr.hbm [resolvable:$true] %s433_s14 }
 0x16e   : > { %s431_s27 = sshll.u32 %s300_s21, 4  ;;  %s408_s0 = scalar_lea.sflag [#allocation9], %s1000_s25  ;;  %s432_s27 = int_to_ptr.vmem [resolvable:$true] %s431_s27 }
 0x16f   : > { %s754_s18 = sshra.s32 %s434_s14, 4  ;;  %s760_s29 = scalar_lea.hbm %s1070_s4, 2  ;;  %s755_s18 = int_to_ptr.hbm [resolvable:$true] %s754_s18 }
 0x170   : > { %s756_s5 = scalar_lea.hbm %s755_s18, 1  ;;  %p761_p6 = scmp.lt.s32.totalorder %s755_s18, %s1070_s4 }
 0x171   : > { %s581_s26 = spop %580  ;;  %p757_p7 = scmp.ne.s32.totalorder %s755_s18, %s756_s5 }
 0x172   : > { %v401_v50 = vstv %s581_s26  ;;  %p762_p8 = scmp.lt.s32.totalorder %s760_s29, %s756_s5 }
 0x173   : > { %402 = vst [vmem:[%s300_s21] sm:$0x1] %v401_v50  ;;  %p758_p9 = pnand %p757_p7, %p961_p1 }
 0x174   : > { %p763_p11 = por %p762_p8, %p761_p6 }
 0x175   : > { %p759_p10 = pneg %p758_p9 }
 0x177   : > { %p764_p12 = pnand %p763_p11, %p759_p10 }
 0x179   : > { %767 = shalt.err (!%p764_p12)
}
 0x17a   : > { %585 = dma.vmem_to_hbm [thread:$0]  (%p961_p1), %s432_s27, 16, %s434_s14, %s408_s0  }
 0x17b PF: > { %s445_s25 = sand.u32 1, %s818_s15   ;;  %p593_p13 = pnand %p562_p2, %p966_p3 }
 0x17c   : > { %s446_s24 = scalar_lea.sflag [#allocation6], %s445_s25 }
 0x17d   : > { %p594_p0 = pneg %p593_p13 }
 0x17f   : > { %809 = dma.done.wait (%p594_p0), %s446_s24, 16  }
 0x180   : > { %811 = vsyncadd (%p594_p0), %s446_s24, 4294967280  ;;  %s455_s7 = scalar_lea.sflag [#allocation9], %s445_s25 }
 0x181   : > { %813 = dma.done.wait (%p594_p0), %s455_s7, 16  }
 0x182   : > { %815 = vsyncadd (%p594_p0), %s455_s7, 4294967280  ;;  %s24_s23 = sadd.s32 1, %s850_s23   ;;  %s1081_s21 = sld [smem:[#allocation13_spill]] }
 0x183   : > { %p21_p4 = scmp.ge.s32.totalorder %s24_s23, 4   ;;  %s1082_s22 = sld [smem:[#allocation14_spill]] }
 0x184   : > { %s1083_s15 = smov %s822_s16  ;;  %s1084_s16 = smov %s826_s17 }
 0x185   : > { %s1085_s17 = smov %s952_s9  ;;  %s1086_s18 = smov %s834_s19 }
 0x186   : > { %s1087_s19 = smov %s838_s20  ;;  %s1088_s20 = smov %s955_s10 }
 0x187   :  { %23 = sbr.rel (!%p21_p4) target bundleno = 12 (0xc), region = 108 }
 0x18c   :  { %460 = vsyncpa [#allocation5], 1 }
 0x18d   :  { %462 = vsyncpa [#allocation5 + $0x1], 1 }
 0x18e   :  { %463 = vsyncpa [#allocation6], 1 }
 0x18f   :  { %465 = vsyncpa [#allocation6 + $0x1], 1 }
 0x190   :  { %466 = vsyncpa [#allocation9], 1 }
 0x191   :  { %468 = vsyncpa [#allocation9 + $0x1], 1 }

</bundles_post_ra>
